<compile_context>
chip_gen: v7x
topology: tpu7x:2x2x1
jax: 0.10.0
libtpu: 0.0.40
codegen_flags: <defaults>
</compile_context>

<pallas_src>
import functools
import math

import jax
import jax.numpy as jnp
from jax import lax
from jax.experimental import pallas as pl
from jax.experimental.pallas import tpu as pltpu


_INV_SQRT2 = 0.7071067811865476        # 1 / sqrt(2)
_SQRT_2_OVER_PI = 0.7978845608028654   # sqrt(2 / pi)


def _round_up(n, m):
    return pl.cdiv(n, m) * m


def _pad2d(a, rows, cols):
    r, c = a.shape
    if (r, c) == (rows, cols):
        return a
    return jnp.pad(a, ((0, rows - r), (0, cols - c)))


# --------------------------------------------------------------------------
# Kernel
# --------------------------------------------------------------------------
def _ffn_kernel(x_ref, w1_ref, b1_ref, w2_ref, b2_ref, o_ref, acc_ref,
                *, approximate_gelu):
    # x_ref:  (tm, Hp)   w1_ref: (Hp, tf)   b1_ref: (1, tf)  [f32]
    # w2_ref: (tf, Hp)   b2_ref: (1, Hp) [f32]
    # o_ref:  (tm, Hp)   acc_ref: (tm, Hp) f32 scratch (persists across f)
    f = pl.program_id(1)

    @pl.when(f == 0)
    def _():
        acc_ref[...] = jnp.zeros_like(acc_ref)

    # layer1 partial slab: native-dtype MXU matmul, f32 accumulation.
    h = jnp.dot(x_ref[...], w1_ref[...], preferred_element_type=jnp.float32)
    h = h + b1_ref[...]                       # bias already f32

    if approximate_gelu:
        # tanh-form GELU: runs on the EUP (separate bundle slot) instead of the
        # long erf polynomial on the VALU — useful on v5e / small H.
        h = 0.5 * h * (1.0 + jnp.tanh(_SQRT_2_OVER_PI *
                                      (h + 0.044715 * h * h * h)))
    else:
        # exact erf GELU — matches torch.nn.GELU() default.
        h = 0.5 * h * (1.0 + lax.erf(h * _INV_SQRT2))

    # layer2 partial slab: cast GELU output to the weight dtype (bf16 weights
    # feed the MXU directly; no-op for f32), accumulate in f32.
    acc_ref[...] += jnp.dot(h.astype(w2_ref.dtype), w2_ref[...],
                            preferred_element_type=jnp.float32)

    @pl.when(f == pl.num_programs(1) - 1)
    def _():
        o_ref[...] = (acc_ref[...] + b2_ref[...]).astype(o_ref.dtype)


# --------------------------------------------------------------------------
# Planning (generation-aware tile sizes + VMEM budget)
# --------------------------------------------------------------------------
def _vmem_budget_bytes():
    try:
        cap = pltpu.get_tpu_info().vmem_capacity_bytes
    except Exception:
        cap = 64 * 1024 * 1024  # conservative fallback (v7x per-TC VMEM)
    # ~20% headroom: ≈51 MiB on 64 MiB parts (v7x), ≈102 MiB on 128 MiB parts.
    return int(cap * 0.8)


def plan_ffn(M, H, F, x_dtype, w_dtype, *, max_tm=512):
    Hp = _round_up(H, 128)
    x_isz = jnp.dtype(x_dtype).itemsize
    w_isz = jnp.dtype(w_dtype).itemsize
    budget = _vmem_budget_bytes()

    # Row tile: multiple of 8, <= max_tm, and >= 2 row tiles whenever M allows,
    # so v7x's two TensorCores can split the "parallel" m axis.
    n_row_tiles = max(2, pl.cdiv(M, max_tm))
    tm = max(8, min(max_tm, _round_up(pl.cdiv(M, n_row_tiles), 8)))

    # F tile: multiple of 128.  Prefer the whole padded F (weights resident,
    # DMA'd once, single-buffered); otherwise halve until the working set fits
    # the per-generation VMEM budget.
    F128 = _round_up(F, 128)

    def working_set(tf, resident):
        wbuf = 1 if resident else 2                 # Buffered(1) vs double-buffered
        return (2 * tm * Hp * x_isz                 # x tile (double-buffered)
                + 2 * tm * Hp * x_isz               # out tile (double-buffered)
                + tm * Hp * 4                       # f32 accumulator scratch
                + wbuf * 2 * Hp * tf * w_isz        # W1 + W2 slabs
                + wbuf * tf * 4 + Hp * 4            # f32 biases
                + tm * tf * 4)                      # (tm, tf) f32 GELU intermediate

    tf = F128
    while tf > 128 and working_set(tf, tf == F128) > budget:
        tf = max(128, _round_up(tf // 2, 128))

    Fp = _round_up(F128, tf)     # whole number of F tiles (padding is exact: zeros)
    return dict(Hp=Hp, Fp=Fp, tm=tm, tf=tf, vmem_limit=budget)


def prepare_ffn_params(w1, b1, w2, b2, plan):
    """Pad weights and pre-cast biases to f32 once (hoist out of the step)."""
    Hp, Fp = plan["Hp"], plan["Fp"]
    w1_p = _pad2d(w1, Hp, Fp)
    w2_p = _pad2d(w2, Fp, Hp)
    b1_p = _pad2d(b1.reshape(1, -1).astype(jnp.float32), 1, Fp)
    b2_p = _pad2d(b2.reshape(1, -1).astype(jnp.float32), 1, Hp)
    return w1_p, b1_p, w2_p, b2_p


# --------------------------------------------------------------------------
# pallas_call wrapper
# --------------------------------------------------------------------------
def ffn_pallas(x_p, w1_p, b1_p, w2_p, b2_p, *, tm, tf, vmem_limit,
               approximate_gelu=False, out_dtype=None):
    M, Hp = x_p.shape
    Fp = w1_p.shape[1]
    assert Fp % tf == 0
    grid_m = pl.cdiv(M, tm)      # partial last row tile OK: rows independent
    grid_f = Fp // tf
    out_dtype = out_dtype or x_p.dtype

    resident = grid_f == 1
    single = pl.Buffered(1)

    def wspec(shape, index_map):
        # Resident weights never change block index -> one VMEM buffer suffices.
        if resident:
            return pl.BlockSpec(shape, index_map, pipeline_mode=single)
        return pl.BlockSpec(shape, index_map)

    x_isz = jnp.dtype(x_p.dtype).itemsize
    w_isz = jnp.dtype(w1_p.dtype).itemsize
    weight_bytes = 2 * Hp * Fp * w_isz
    cost = pl.CostEstimate(
        flops=4 * M * Hp * Fp,                    # two matmuls
        transcendentals=M * Fp,                   # GELU per hidden element
        bytes_accessed=(2 * M * Hp * x_isz
                        + (weight_bytes if resident else grid_m * weight_bytes)
                        + (Fp + Hp) * 4),
    )

    kernel = functools.partial(_ffn_kernel, approximate_gelu=approximate_gelu)

    return pl.pallas_call(
        kernel,
        out_shape=jax.ShapeDtypeStruct((M, Hp), out_dtype),
        grid_spec=pltpu.PrefetchScalarGridSpec(
            num_scalar_prefetch=0,
            grid=(grid_m, grid_f),
            in_specs=[
                pl.BlockSpec((tm, Hp), lambda i, f: (i, 0)),   # x tile (resident across f)
                wspec((Hp, tf), lambda i, f: (0, f)),          # W1 slab
                wspec((1, tf), lambda i, f: (0, f)),           # b1 slab (f32)
                wspec((tf, Hp), lambda i, f: (f, 0)),          # W2 slab
                pl.BlockSpec((1, Hp), lambda i, f: (0, 0),
                             pipeline_mode=single),            # b2 (f32, constant)
            ],
            out_specs=pl.BlockSpec((tm, Hp), lambda i, f: (i, 0)),
            scratch_shapes=[pltpu.VMEM((tm, Hp), jnp.float32)],
        ),
        compiler_params=pltpu.CompilerParams(
            dimension_semantics=("parallel", "arbitrary"),
            vmem_limit_bytes=vmem_limit,
        ),
        cost_estimate=cost,
    )(x_p, w1_p, b1_p, w2_p, b2_p)


def feed_forward(x, w1, b1, w2, b2, *, approximate_gelu=False):
    """x: (..., hidden); w1: (hidden, ffn); b1: (1, ffn); w2: (ffn, hidden); b2: (1, hidden)."""
    lead = x.shape[:-1]
    H = x.shape[-1]
    F = w1.shape[1]
    x2d = x.reshape((-1, H))
    M = x2d.shape[0]

    plan = plan_ffn(M, H, F, x.dtype, w1.dtype)
    # TODO(synk): in a real train/serve step, call prepare_ffn_params once at
    # setup time and pass padded params in, instead of re-padding per call.
    w1_p, b1_p, w2_p, b2_p = prepare_ffn_params(w1, b1, w2, b2, plan)

    Hp = plan["Hp"]
    x_p = x2d if Hp == H else jnp.pad(x2d, ((0, 0), (0, Hp - H)))  # no M padding

    y_p = ffn_pallas(x_p, w1_p, b1_p, w2_p, b2_p,
                     tm=plan["tm"], tf=plan["tf"], vmem_limit=plan["vmem_limit"],
                     approximate_gelu=approximate_gelu, out_dtype=x.dtype)
    y = y_p if Hp == H else y_p[:, :H]
    return y.reshape(lead + (H,))


# --------------------------------------------------------------------------
# Reference + self-test
# --------------------------------------------------------------------------
def _reference(x2d, w1, b1, w2, b2):
    h = x2d @ w1 + b1[0]
    h = 0.5 * h * (1.0 + lax.erf(h * _INV_SQRT2))
    return h @ w2 + b2[0]


if __name__ == "__main__":
    # Small shapes consistent with the module: batch=2, seq=8, hidden=32, ffn=64
    batch, seq, hidden_size, ffn_size = 2, 8, 32, 64

    key = jax.random.PRNGKey(0)
    kx, k1, k2, k3, k4 = jax.random.split(key, 5)

    x = jax.random.normal(kx, (batch, seq, hidden_size), dtype=jnp.float32)

    # Deterministic parameter init (PyTorch nn.Linear-style uniform bounds),
    # stored as (in, out) so the kernel computes x @ W.
    bound1 = 1.0 / math.sqrt(hidden_size)
    w1 = jax.random.uniform(k1, (hidden_size, ffn_size), jnp.float32, -bound1, bound1)
    b1 = jax.random.uniform(k2, (1, ffn_size), jnp.float32, -bound1, bound1)
    bound2 = 1.0 / math.sqrt(ffn_size)
    w2 = jax.random.uniform(k3, (ffn_size, hidden_size), jnp.float32, -bound2, bound2)
    b2 = jax.random.uniform(k4, (1, hidden_size), jnp.float32, -bound2, bound2)

    y = feed_forward(x, w1, b1, w2, b2)
    y = jax.block_until_ready(y)

    # correctness check against plain-JAX reference (f32 inputs -> tight tol)
    y_ref = _reference(x.reshape(-1, hidden_size), w1, b1, w2, b2).reshape(y.shape)
    assert y.shape == x.shape, "shape mismatch"
    assert jnp.allclose(y, y_ref, atol=1e-5, rtol=1e-5), "mismatch vs reference"

    print("KERNEL_OK")
</pallas_src>

<mosaic_0001>
module attributes {stable_mosaic.version = 11 : i64} {
  func.func @_ffn_kernel(%arg0: i32, %arg1: i32, %arg2: memref<8x128xf32, #tpu.memory_space<vmem>>, %arg3: memref<128x128xf32, #tpu.memory_space<vmem>>, %arg4: memref<1x128xf32, #tpu.memory_space<vmem>>, %arg5: memref<128x128xf32, #tpu.memory_space<vmem>>, %arg6: memref<1x128xf32, #tpu.memory_space<vmem>>, %arg7: memref<8x128xf32, #tpu.memory_space<vmem>>, %arg8: memref<8x128xf32, #tpu.memory_space<vmem>>) attributes {dimension_semantics = [#tpu.dimension_semantics<parallel>, #tpu.dimension_semantics<arbitrary>], iteration_bounds = array<i64: 2, 1>, scalar_prefetch = 0 : i64, scratch_operands = 1 : i64, tpu.core_type = #tpu.core_type<tc>, window_params = [{transform_indices = @transform_0, window_bounds = array<i64: 8, 128>}, {pipeline_mode = #tpu.pipeline_mode<synchronous>, transform_indices = @transform_1, window_bounds = array<i64: 128, 128>}, {pipeline_mode = #tpu.pipeline_mode<synchronous>, transform_indices = @transform_2, window_bounds = array<i64: 1, 128>}, {pipeline_mode = #tpu.pipeline_mode<synchronous>, transform_indices = @transform_3, window_bounds = array<i64: 128, 128>}, {pipeline_mode = #tpu.pipeline_mode<synchronous>, transform_indices = @transform_4, window_bounds = array<i64: 1, 128>}, {transform_indices = @transform_5, window_bounds = array<i64: 8, 128>}]} {
    %c0_i32 = arith.constant 0 : i32
    %0 = arith.cmpi eq, %arg1, %c0_i32 : i32
    %1 = arith.extui %0 : i1 to i32
    %c0_i32_0 = arith.constant 0 : i32
    %2 = arith.cmpi ne, %1, %c0_i32_0 : i32
    scf.if %2 {
      %cst_18 = arith.constant 0.000000e+00 : f32
      %25 = vector.broadcast %cst_18 : f32 to vector<8x128xf32>
      %c0_19 = arith.constant 0 : index
      %c0_20 = arith.constant 0 : index
      %26 = vector.load %arg8[%c0_19, %c0_20] : memref<8x128xf32, #tpu.memory_space<vmem>>, vector<8x128xf32>
      tpu.vector_store %arg8[%c0_19, %c0_20], %25 {strides = array<i32>} : memref<8x128xf32, #tpu.memory_space<vmem>>, vector<8x128xf32>,
    } else {
    }
    %c0 = arith.constant 0 : index
    %c0_1 = arith.constant 0 : index
    %3 = vector.load %arg2[%c0, %c0_1] : memref<8x128xf32, #tpu.memory_space<vmem>>, vector<8x128xf32>
    %c0_2 = arith.constant 0 : index
    %c0_3 = arith.constant 0 : index
    %4 = vector.load %arg3[%c0_2, %c0_3] : memref<128x128xf32, #tpu.memory_space<vmem>>, vector<128x128xf32>
    %cst = arith.constant dense<0.000000e+00> : vector<8x128xf32>
    %5 = tpu.matmul %3, %4, %cst {dimension_numbers = #tpu.dot_dimension_numbers<[1], [0], [0], [1], [0, 0, 1, 1], [], []>} : vector<8x128xf32>, vector<128x128xf32>, vector<8x128xf32> -> vector<8x128xf32>
    %c0_4 = arith.constant 0 : index
    %c0_5 = arith.constant 0 : index
    %6 = vector.load %arg4[%c0_4, %c0_5] : memref<1x128xf32, #tpu.memory_space<vmem>>, vector<1x128xf32>
    %7 = vector.broadcast %6 : vector<1x128xf32> to vector<8x128xf32>
    %8 = arith.addf %5, %7 : vector<8x128xf32>
    %cst_6 = arith.constant 5.000000e-01 : f32
    %9 = vector.broadcast %cst_6 : f32 to vector<8x128xf32>
    %10 = arith.mulf %9, %8 : vector<8x128xf32>
    %cst_7 = arith.constant 0.707106769 : f32
    %11 = vector.broadcast %cst_7 : f32 to vector<8x128xf32>
    %12 = arith.mulf %8, %11 : vector<8x128xf32>
    %13 = math.erf %12 : vector<8x128xf32>
    %cst_8 = arith.constant 1.000000e+00 : f32
    %14 = vector.broadcast %cst_8 : f32 to vector<8x128xf32>
    %15 = arith.addf %14, %13 : vector<8x128xf32>
    %16 = arith.mulf %10, %15 : vector<8x128xf32>
    %c0_9 = arith.constant 0 : index
    %c0_10 = arith.constant 0 : index
    %17 = vector.load %arg8[%c0_9, %c0_10] : memref<8x128xf32, #tpu.memory_space<vmem>>, vector<8x128xf32>
    %c0_11 = arith.constant 0 : index
    %c0_12 = arith.constant 0 : index
    %18 = vector.load %arg5[%c0_11, %c0_12] : memref<128x128xf32, #tpu.memory_space<vmem>>, vector<128x128xf32>
    %cst_13 = arith.constant dense<0.000000e+00> : vector<8x128xf32>
    %19 = tpu.matmul %16, %18, %cst_13 {dimension_numbers = #tpu.dot_dimension_numbers<[1], [0], [0], [1], [0, 0, 1, 1], [], []>} : vector<8x128xf32>, vector<128x128xf32>, vector<8x128xf32> -> vector<8x128xf32>
    %20 = arith.addf %17, %19 : vector<8x128xf32>
    %c0_14 = arith.constant 0 : index
    %c0_15 = arith.constant 0 : index
    %21 = vector.load %arg8[%c0_14, %c0_15] : memref<8x128xf32, #tpu.memory_space<vmem>>, vector<8x128xf32>
    tpu.vector_store %arg8[%c0_14, %c0_15], %20 {strides = array<i32>} : memref<8x128xf32, #tpu.memory_space<vmem>>, vector<8x128xf32>,
    %c0_i32_16 = arith.constant 0 : i32
    %22 = arith.cmpi eq, %arg1, %c0_i32_16 : i32
    %23 = arith.extui %22 : i1 to i32
    %c0_i32_17 = arith.constant 0 : i32
    %24 = arith.cmpi ne, %23, %c0_i32_17 : i32
    scf.if %24 {
      %c0_18 = arith.constant 0 : index
      %c0_19 = arith.constant 0 : index
      %25 = vector.load %arg8[%c0_18, %c0_19] : memref<8x128xf32, #tpu.memory_space<vmem>>, vector<8x128xf32>
      %c0_20 = arith.constant 0 : index
      %c0_21 = arith.constant 0 : index
      %26 = vector.load %arg6[%c0_20, %c0_21] : memref<1x128xf32, #tpu.memory_space<vmem>>, vector<1x128xf32>
      %27 = vector.broadcast %26 : vector<1x128xf32> to vector<8x128xf32>
      %28 = arith.addf %25, %27 : vector<8x128xf32>
      %c0_22 = arith.constant 0 : index
      %c0_23 = arith.constant 0 : index
      %29 = vector.load %arg7[%c0_22, %c0_23] : memref<8x128xf32, #tpu.memory_space<vmem>>, vector<8x128xf32>
      tpu.vector_store %arg7[%c0_22, %c0_23], %28 {strides = array<i32>} : memref<8x128xf32, #tpu.memory_space<vmem>>, vector<8x128xf32>,
    } else {
    }
    return
  }
  func.func @transform_0(%arg0: i32, %arg1: i32) -> (i32, i32) {
    %c0_i32 = arith.constant 0 : i32
    %c0_i32_0 = arith.constant 0 : i32
    return %arg0, %c0_i32 : i32, i32
  }
  func.func @transform_1(%arg0: i32, %arg1: i32) -> (i32, i32) {
    %c0_i32 = arith.constant 0 : i32
    %c0_i32_0 = arith.constant 0 : i32
    return %c0_i32, %arg1 : i32, i32
  }
  func.func @transform_2(%arg0: i32, %arg1: i32) -> (i32, i32) {
    %c0_i32 = arith.constant 0 : i32
    %c0_i32_0 = arith.constant 0 : i32
    return %c0_i32, %arg1 : i32, i32
  }
  func.func @transform_3(%arg0: i32, %arg1: i32) -> (i32, i32) {
    %c0_i32 = arith.constant 0 : i32
    %c0_i32_0 = arith.constant 0 : i32
    return %arg1, %c0_i32 : i32, i32
  }
  func.func @transform_4(%arg0: i32, %arg1: i32) -> (i32, i32) {
    %c0_i32 = arith.constant 0 : i32
    %c0_i32_0 = arith.constant 0 : i32
    %c0_i32_1 = arith.constant 0 : i32
    return %c0_i32, %c0_i32_0 : i32, i32
  }
  func.func @transform_5(%arg0: i32, %arg1: i32) -> (i32, i32) {
    %c0_i32 = arith.constant 0 : i32
    %c0_i32_0 = arith.constant 0 : i32
    return %arg0, %c0_i32 : i32, i32
  }
}

</mosaic_0001>

<bundles_post_ra>
// kernel: tpu_custom_call.1
= control target key start
LH: loop header
LB: loop body
LE: loop exit
PB: predicated region body
PF: predicated region fallthrough
CT: control target
= control target key end

     0   :  { %10 = vsyncpa [#allocation4], 0  ;;  %s1398_s0 = inlined_call_operand.hbm [shape: f32[16,128], index: 0, kind: input, shape index: {}]   ;;  %s1399_s1 = inlined_call_operand.hbm [shape: f32[128,128], index: 1, kind: input, shape index: {}]   ;;  %s1400_s2 = inlined_call_operand.vmem [shape: f32[1,128], index: 2, kind: input, shape index: {}]   ;;  %s1401_s3 = inlined_call_operand.hbm [shape: f32[128,128], index: 3, kind: input, shape index: {}]   ;;  %s1402_s4 = inlined_call_operand.vmem [shape: f32[1,128], index: 4, kind: input, shape index: {}]   ;;  %s1403_s5 = inlined_call_operand.hbm [shape: f32[16,128], index: 5, kind: output, shape index: {}]  }
   0x1   :  { %12 = vsyncpa [#allocation4 + $0x1], 0 }
   0x2   :  { %13 = vsyncpa [#allocation7], 0 }
   0x3   :  { %14 = vsyncpa [#allocation5], 0 }
   0x4   :  { %16 = vsyncpa [#allocation5 + $0x1], 0  ;;  %s1119_s18 = smov 0   ;;  %s1121_s19 = smov 0  }
   0x5   :  { %s1123_s20 = smov 0   ;;  %s1125_s21 = smov 0  }
   0x6   :  { %s1127_s22 = smov 0   ;;  %s1129_s23 = smov 0  }
   0x7 LB: > { %s644_s24 = sadd.s32 4294967295, %s1078_s23   ;;  %s645_s25 = sadd.s32 4294967294, %s1078_s23   ;;  %s1078_s23 = sphi %s1129_s23, %s22_s23   ;;  %s1074_s22 = sphi %s1127_s22, %s1425_s22   ;;  %s1070_s21 = sphi %s1125_s21, %s1424_s21   ;;  %s1066_s20 = sphi %s1123_s20, %s1423_s20   ;;  %s1062_s19 = sphi %s1121_s19, %s1422_s19   ;;  %s1058_s18 = sphi %s1119_s18, %s1421_s18  }
   0x8   : > { %p54_p0 = scmp.ne.s32.totalorder %s1062_s19, %s1058_s18  ;;  %p1153_p1 = scmp.eq.s32.totalorder %s644_s24, 0 }
   0x9   : > { %p1157_p2 = scmp.eq.s32.totalorder %s644_s24, 1  ;;  %p183_p3 = scmp.eq.s32.totalorder %s645_s25, 1 }
   0xa   : > { %s1408_s26 = scalar_select %p1153_p1, 1, 0 }
   0xb   : > { %p1163_p4 = por %p1153_p1, %p54_p0  ;;  %p646_p5 = scmp.ge.s32.totalorder %s1078_s23, 1 }
   0xc   : > { %p1168_p6 = por %p183_p3, %p54_p0  ;;  %p190_p7 = scmp.lt.s32.totalorder %s1078_s23, 3 }
   0xd   : > { %s1410_s28 = scalar_select %p1163_p4, 1, 0 }
   0xe   : > { %s1411_s29 = scalar_select %p1168_p6, 1, 0 }
   0xf   : > { %p1173_p8 = pnand %p646_p5, %p190_p7  ;;  %s1080_s6 = smov [#allocation6]  }
  0x10   : > { %s204_s7 = sshll.u32 %s1080_s6, 4  ;;  %s1081_s9 = smov [#allocation8]   ;;  %s1177_s7 = int_to_ptr.vmem [resolvable:$true] %s204_s7 }
  0x11   : > { %p828_p9 = pneg %p1173_p8  ;;  %s226_s10 = sshll.u32 %s1081_s9, 4  ;;  %s1188_s10 = int_to_ptr.vmem [resolvable:$true] %s226_s10 }
  0x12   : > { %s906_s13 = scalar_lea.hbm %s1399_s1, 2048 }
  0x13   : > { %p1184_p11 = pnand %p828_p9, %p1153_p1  ;;  %p907_p12 = scmp.ne.s32.totalorder %s1399_s1, %s906_s13 }
  0x14   : > { %p913_p5 = scmp.lt.u32.totalorder %s906_s13, %s1399_s1 }
  0x15   : > { %p908_p13 = pneg %p1184_p11 }
  0x17   : > { %p909_p0 = pnand %p908_p13, %p907_p12 }
  0x19   : > { %p910_p3 = pneg %p909_p0 }
  0x1b   : > { %p915_p7 = pnand %p913_p5, %p910_p3 }
  0x1d   : > { %918 = shalt.err (!%p915_p7)
}
  0x1e   : > { %s919_s24 = scalar_lea.vmem %s1177_s7, 2048  ;;  %p927_p1 = scmp.lt.s32.totalorder %s1177_s7, %s1177_s7 }
  0x1f   : > { %p920_p9 = scmp.ne.s32.totalorder %s1177_s7, %s919_s24  ;;  %p928_p12 = scmp.lt.s32.totalorder %s919_s24, %s919_s24 }
  0x21   : > { %p922_p10 = pnand %p920_p9, %p908_p13  ;;  %p929_p0 = por %p928_p12, %p927_p1 }
  0x23   : > { %p923_p6 = pneg %p922_p10 }
  0x25   : > { %p930_p4 = pnand %p929_p0, %p923_p6 }
  0x27   : > { %933 = shalt.err (!%p930_p4)
}
  0x28   : > { %s1082_s25 = smov 128   ;;  %s1083_s6 = smov 8  }
  0x29   : > { %831 = dma.hbm_to_vmem [thread:$0]  (!%p1184_p11), %s1399_s1, 2048, %s1177_s7, [#allocation7], %s1082_s25, %s1082_s25, %s1083_s6  }
  0x2a   : > { %s934_s14 = scalar_lea.hbm %s1401_s3, 2048 }
  0x2b   : > { %p935_p1 = scmp.ne.s32.totalorder %s1401_s3, %s934_s14  ;;  %p941_p10 = scmp.lt.u32.totalorder %s934_s14, %s1401_s3 }
  0x2d   : > { %p937_p4 = pnand %p935_p1, %p908_p13 }
  0x2f   : > { %p938_p6 = pneg %p937_p4 }
  0x31   : > { %p943_p3 = pnand %p941_p10, %p938_p6 }
  0x33   : > { %946 = shalt.err (!%p943_p3)
}
  0x34   : > { %s947_s7 = scalar_lea.vmem %s1188_s10, 2048  ;;  %p955_p12 = scmp.lt.s32.totalorder %s1188_s10, %s1188_s10 }
  0x35   : > { %p948_p5 = scmp.ne.s32.totalorder %s1188_s10, %s947_s7  ;;  %p956_p0 = scmp.lt.s32.totalorder %s947_s7, %s947_s7 }
  0x37   : > { %p950_p7 = pnand %p948_p5, %p908_p13  ;;  %p957_p1 = por %p956_p0, %p955_p12 }
  0x39   : > { %p951_p9 = pneg %p950_p7 }
  0x3b   : > { %p958_p4 = pnand %p957_p1, %p951_p9 }
  0x3d   : > { %961 = shalt.err (!%p958_p4)
}
  0x3e   : > { %834 = dma.hbm_to_vmem [thread:$0]  (!%p1184_p11), %s1401_s3, 2048, %s1188_s10, [#allocation7], %s1082_s25, %s1082_s25, %s1083_s6  }
  0x3f   : > { %s34_s12 = sadd.s32 1, %s1074_s22  ;;  %s41_s13 = sadd.s32 1, %s1066_s20 }
  0x40   : > { %p36_p13 = scmp.ge.s32.totalorder %s34_s12, 2  ;;  %p48_p6 = scmp.ne.s32.totalorder %s1066_s20, %s1062_s19 }
  0x41   : > { %p49_p10 = scmp.eq.s32.totalorder %s1078_s23, 0  ;;  %p845_p3 = scmp.lt.s32.totalorder %s1078_s23, 2 }
  0x42   : > { %s1427_s12 = smov (%p36_p13, %s34_s12), 0  ;;  %p1252_p7 = por %p1157_p2, %p48_p6 }
  0x43   : > { %p50_p5 = por %p49_p10, %p48_p6  ;;  %s38_s14 = ssub.s32 %s1074_s22, %s1427_s12 }
  0x44   : > { %s1414_s8 = scalar_select %p1252_p7, 1, 0 }
  0x45   : > { %s243_s15 = sand.u32 1, %s1066_s20   ;;  %p39_p9 = scmp.eq.s32.totalorder %s38_s14, 0 }
  0x46   : > { %s651_s10 = sshll.u32 %s243_s15, 3  ;;  %s652_s25 = sshll.u32 %s1074_s22, 7 }
  0x47   : > { %s1261_s6 = scalar_select %p39_p9, %s1066_s20, %s41_s13  }
  0x48   : > { %s1266_s24 = scalar_lea.hbm %s1398_s0, %s652_s25  ;;  %s247_s27 = scalar_lea.vmem [#allocation3], %s651_s10 }
  0x49   : > { %s254_s7 = sshll.u32 %s247_s27, 4  ;;  %p1270_p2 = pnand %p845_p3, %p50_p5  ;;  %s1274_s7 = int_to_ptr.vmem [resolvable:$true] %s254_s7 }
  0x4a   : > { %s244_s11 = scalar_lea.sflag [#allocation4], %s243_s15  ;;  %s962_s13 = scalar_lea.hbm %s1266_s24, 128 }
  0x4b   : > { %p963_p11 = scmp.ne.s32.totalorder %s1266_s24, %s962_s13  ;;  %p964_p12 = pneg %p1270_p2 }
  0x4c   : > { %s967_s25 = scalar_lea.hbm %s1398_s0, 256  ;;  %p968_p4 = scmp.lt.u32.totalorder %s1266_s24, %s1398_s0 }
  0x4d   : > { %p965_p0 = pnand %p964_p12, %p963_p11  ;;  %p969_p13 = scmp.lt.u32.totalorder %s967_s25, %s962_s13 }
  0x4e   : > { %p971_p10 = scmp.lt.u32.totalorder %s962_s13, %s1266_s24 }
  0x4f   : > { %p966_p1 = pneg %p965_p0  ;;  %p970_p6 = por %p969_p13, %p968_p4 }
  0x51   : > { %p972_p3 = por %p971_p10, %p970_p6 }
  0x53   : > { %p973_p5 = pnand %p972_p3, %p966_p1 }
  0x55   : > { %976 = shalt.err (!%p973_p5)
}
  0x56   : > { %s977_s15 = scalar_lea.vmem %s1274_s7, 128  ;;  %s1084_s27 = smov [#allocation3]  }
  0x57   : > { %p978_p9 = scmp.ne.s32.totalorder %s1274_s7, %s977_s15  ;;  %s982_s14 = sshll.u32 %s1084_s27, 4  ;;  %s983_s14 = int_to_ptr.vmem [resolvable:$false] %s982_s14 }
  0x58   : > { %s984_s10 = scalar_lea.vmem %s983_s14, 256  ;;  %p985_p7 = scmp.lt.s32.totalorder %s1274_s7, %s983_s14 }
  0x59   : > { %p980_p11 = pnand %p978_p9, %p964_p12  ;;  %p986_p4 = scmp.lt.s32.totalorder %s984_s10, %s977_s15 }
  0x5b   : > { %p981_p0 = pneg %p980_p11  ;;  %p987_p13 = por %p986_p4, %p985_p7 }
  0x5d   : > { %p988_p6 = pnand %p987_p13, %p981_p0 }
  0x5f   : > { %991 = shalt.err (!%p988_p6)
}
  0x60   : > { %838 = dma.hbm_to_vmem [thread:$0]  (!%p1270_p2), %s1266_s24, 128, %s1274_s7, %s244_s11  }
  0x61   : > { %263 = sbr.rel (%p1173_p8) target bundleno = 602 (0x25a), region = 40  ;;  %s1304_s13 = sand.u32 (!%p1173_p8), 1, %s1062_s19  }
  0x62   : > { %s654_s25 = sshll.u32 (!%p1173_p8), %s1304_s13, 3  ;;  %s266_s16 = scalar_lea.sflag (!%p1173_p8), [#allocation4], %s1304_s13 }
  0x63   : > { %s1310_s17 = scalar_lea.vmem (!%p1173_p8), [#allocation3], %s654_s25  ;;  %p1416_p7 = scmp.ne.s32.totalorder (!%p1173_p8), %s1410_s28, 0 }
  0x68   : > { %1045 = dma.done.wait (%p1416_p7), %s266_s16, 128  }
  0x69   : > { %1047 = vsyncadd (%p1416_p7), %s266_s16, 4294967168  ;;  %p1417_p2 = scmp.ne.s32.totalorder %s1408_s26, 0 }
  0x6b   : > { %1049 = dma.done.wait (%p1417_p2), [#allocation7], 4096  }
  0x6c   : > { %1051 = vsyncadd (%p1417_p2), [#allocation7], 4294963200  ;;  %v1085_v0 = vmov 0.0|0.0   ;;  %vm1086_vm0 = vmmov 0   ;;  %v1087_v1 = vmov 0.0   ;;  %v317_v2 = vld [vmem:[#allocation6] sm:$0xff] }
  0x6d   : > { %768 = vmatprep.subr.bf16.mxu0 %v1085_v0  ;;  %730 = vmatprep.mubr.msk.f32.mxu0 %vm1086_vm0, %v1087_v1  ;;  %v318_v3 = vld [vmem:[#allocation6 + $0x8] sm:$0xff]  ;;  %v319_v4 = vld [vmem:[#allocation6 + $0x10] sm:$0xff]  ;;  %v320_v6 = vld [vmem:[#allocation6 + $0x18] sm:$0xff]  ;;  %s661_s7 = sshll.u32 %s1070_s21, 7  ;;  %s306_s9 = scalar_lea.vmem [#allocation9], %s654_s25 }
  0x6e   : > { %792 = vmatprep.subr.bf16.mxu1 %v1085_v0  ;;  %765 = vmatprep.mubr.msk.f32.mxu1 %vm1086_vm0, %v1087_v1  ;;  %v769_v5 = vpack.c.bf16 %v318_v3, %v317_v2  ;;  %v772_v7 = vpack.c.bf16 %v320_v6, %v319_v4  ;;  %v321_v8 = vld [vmem:[#allocation6 + $0x20] sm:$0xff]  ;;  %v322_v9 = vld [vmem:[#allocation6 + $0x28] sm:$0xff]  ;;  %v418_v12 = vld [vmem:[#allocation8 + $0x10] sm:$0xff]  ;;  %s531_s11 = sshll.u32 %s306_s9, 4  ;;  %s1349_s14 = scalar_lea.hbm %s1403_s5, %s661_s7  ;;  %s1351_s11 = int_to_ptr.vmem [resolvable:$true] %s531_s11 }
  0x6f   : > { %v416_v10 = vld [vmem:[#allocation8] sm:$0xff]  ;;  %v417_v11 = vld [vmem:[#allocation8 + $0x8] sm:$0xff]  ;;  %v419_v13 = vld [vmem:[#allocation8 + $0x18] sm:$0xff]  ;;  %v775_v14 = vpack.c.bf16 %v322_v9, %v321_v8  ;;  %s518_s10 = scalar_lea.sflag [#allocation5], %s1304_s13  ;;  %s992_s16 = scalar_lea.vmem %s1351_s11, 128 }
  0x70   : > { %770 = vmatpush3.bf16.msra.mxu0 %v769_v5  ;;  %v793_v15 = vpack.c.bf16 %v417_v11, %v416_v10  ;;  %v323_v16 = vld [vmem:[#allocation6 + $0x30] sm:$0xff]  ;;  %v324_v17 = vld [vmem:[#allocation6 + $0x38] sm:$0xff]  ;;  %v796_v18 = vpack.c.bf16 %v419_v13, %v418_v12  ;;  %v420_v19 = vld [vmem:[#allocation8 + $0x20] sm:$0xff]  ;;  %p993_p8 = scmp.ne.s32.totalorder %s1351_s11, %s992_s16  ;;  %p1418_p12 = scmp.ne.s32.totalorder %s1414_s8, 0 }
  0x71   : > { %771 = vmatprep.subr.bf16.mxu0 %v1085_v0  ;;  %v421_v20 = vld [vmem:[#allocation8 + $0x28] sm:$0xff]  ;;  %v778_v21 = vpack.c.bf16 %v324_v17, %v323_v16  ;;  %v325_v22 = vld [vmem:[#allocation6 + $0x40] sm:$0xff]  ;;  %v327_v26 = vld [vmem:[#allocation6 + $0x50] sm:$0xff]  ;;  %s1088_s21 = smov [#allocation9]  }
  0x72   : > { %794 = vmatpush3.bf16.msra.mxu1 %v793_v15  ;;  %v326_v23 = vld [vmem:[#allocation6 + $0x48] sm:$0xff]  ;;  %v799_v24 = vpack.c.bf16 %v421_v20, %v420_v19  ;;  %v328_v27 = vld [vmem:[#allocation6 + $0x58] sm:$0xff]  ;;  %v329_v29 = vld [vmem:[#allocation6 + $0x60] sm:$0xff]  ;;  %p994_p1 = pnand %p993_p8, %p1418_p12  ;;  %s996_s25 = sshll.u32 %s1088_s21, 4  ;;  %s997_s25 = int_to_ptr.vmem [resolvable:$false] %s996_s25 }
  0x73   : > { %795 = vmatprep.subr.bf16.mxu1 %v1085_v0  ;;  %v781_v25 = vpack.c.bf16 %v326_v23, %v325_v22  ;;  %v784_v28 = vpack.c.bf16 %v328_v27, %v327_v26  ;;  %v330_v30 = vld [vmem:[#allocation6 + $0x68] sm:$0xff]  ;;  %v331_v32 = vld [vmem:[#allocation6 + $0x70] sm:$0xff]  ;;  %v332_v33 = vld [vmem:[#allocation6 + $0x78] sm:$0xff]  ;;  %p999_p3 = scmp.lt.s32.totalorder %s1351_s11, %s997_s25 }
  0x74   : > { %773 = vmatpush3.bf16.msra.mxu0 %v772_v7  ;;  %v787_v31 = vpack.c.bf16 %v330_v30, %v329_v29  ;;  %v790_v34 = vpack.c.bf16 %v332_v33, %v331_v32  ;;  %v316_v35 = vld [vmem:[%s1310_s17] sm:$0xff]  ;;  %v424_v39 = vld [vmem:[#allocation8 + $0x40] sm:$0xff]  ;;  %v425_v40 = vld [vmem:[#allocation8 + $0x48] sm:$0xff]  ;;  %p995_p10 = pneg %p994_p1  ;;  %s998_s17 = scalar_lea.vmem %s997_s25, 256 }
  0x75   : > { %774 = vmatprep.subr.bf16.mxu0 %v1085_v0  ;;  %v422_v36 = vld [vmem:[#allocation8 + $0x30] sm:$0xff]  ;;  %v423_v37 = vld [vmem:[#allocation8 + $0x38] sm:$0xff]  ;;  %v805_v41 = vpack.c.bf16 %v425_v40, %v424_v39  ;;  %v428_v45 = vld [vmem:[#allocation8 + $0x60] sm:$0xff]  ;;  %p1000_p5 = scmp.lt.s32.totalorder %s998_s17, %s992_s16 }
  0x76   : > { %797 = vmatpush3.bf16.msra.mxu1 %v796_v18  ;;  %v802_v38 = vpack.c.bf16 %v423_v37, %v422_v36  ;;  %v426_v42 = vld [vmem:[#allocation8 + $0x50] sm:$0xff]  ;;  %v427_v43 = vld [vmem:[#allocation8 + $0x58] sm:$0xff]  ;;  %v429_v46 = vld [vmem:[#allocation8 + $0x68] sm:$0xff] }
  0x77   : > { %798 = vmatprep.subr.bf16.mxu1 %v1085_v0  ;;  %v808_v44 = vpack.c.bf16 %v427_v43, %v426_v42  ;;  %v811_v47 = vpack.c.bf16 %v429_v46, %v428_v45  ;;  %v430_v48 = vld [vmem:[#allocation8 + $0x70] sm:$0xff]  ;;  %v431_v49 = vld [vmem:[#allocation8 + $0x78] sm:$0xff]  ;;  %p1001_p9 = por %p1000_p5, %p999_p3 }
  0x78   : > { %776 = vmatpush3.bf16.msra.mxu0 %v775_v14  ;;  %v814_v50 = vpack.c.bf16 %v431_v49, %v430_v48  ;;  %v658_v51 = vld [vmem:[%s1400_s2] ss:$0 sm:$0xff] }
  0x79   : > { %777 = vmatprep.subr.bf16.mxu0 %v1085_v0  ;;  %v659_v60 = vld [vmem:[%s1402_s4] ss:$0 sm:$0xff]  ;;  %p1002_p11 = pnand %p1001_p9, %p995_p10 }
  0x7a   : > { %800 = vmatpush3.bf16.msra.mxu1 %v799_v24 }
  0x7b   : > { %801 = vmatprep.subr.bf16.mxu1 %v1085_v0 }
  0x7c   : > { %779 = vmatpush3.bf16.msra.mxu0 %v778_v21 }
  0x7d   : > { %780 = vmatprep.subr.bf16.mxu0 %v1085_v0 }
  0x7e   : > { %803 = vmatpush3.bf16.msra.mxu1 %v802_v38 }
  0x7f   : > { %804 = vmatprep.subr.bf16.mxu1 %v1085_v0 }
  0x80   : > { %782 = vmatpush3.bf16.msra.mxu0 %v781_v25 }
  0x81   : > { %783 = vmatprep.subr.bf16.mxu0 %v1085_v0 }
  0x82   : > { %806 = vmatpush3.bf16.msra.mxu1 %v805_v41 }
  0x83   : > { %807 = vmatprep.subr.bf16.mxu1 %v1085_v0 }
  0x84   : > { %785 = vmatpush3.bf16.msra.mxu0 %v784_v28 }
  0x85   : > { %786 = vmatprep.subr.bf16.mxu0 %v1085_v0 }
  0x86   : > { %809 = vmatpush3.bf16.msra.mxu1 %v808_v44 }
  0x87   : > { %810 = vmatprep.subr.bf16.mxu1 %v1085_v0 }
  0x88   : > { %788 = vmatpush3.bf16.msra.mxu0 %v787_v31 }
  0x89   : > { %789 = vmatprep.subr.bf16.mxu0 %v1085_v0 }
  0x8a   : > { %812 = vmatpush3.bf16.msra.mxu1 %v811_v47 }
  0x8b   : > { %813 = vmatprep.subr.bf16.mxu1 %v1085_v0 }
  0x8c   : > { %791 = vmatpush3.bf16.msra.mxu0 %v790_v34 }
  0x8e   : > { %815 = vmatpush3.bf16.msra.mxu1 %v814_v50 }
  0x8f   : > { %731 = vmatmul.mubr.f32.vlgmr.msra.gmra.mrb[0].mxu0 %v316_v35 }
 0x162   : > { %v406_v52 = vpop.f32.mrb[0].mxu0 }
 0x163   : > { %v407_v53 = vadd.f32 %v658_v51, %v406_v52  ;;  %v732_v54 = vpop.f32.mrb[1].mxu0 }
 0x165   : > { %v411_v55 = vmul.f32 0.70710677, %v407_v53  ;;  %v410_v57 = vmul.f32 0.5, %v407_v53 }
 0x167   : > { %904 = verf.f32 %v411_v55 }
 0x171   : > { %v905_v56 = vpop.eup %904 }
 0x172   : > { %v413_v58 = vadd.f32 1.0, %v905_v56 }
 0x174   : > { %v414_v59 = vmul.f32 %v413_v58, %v410_v57 }
 0x176   : > { %766 = vmatmul.mubr.f32.vlgmr.msra.gmra.mrb[0].mxu1 %v414_v59 }
 0x249   : > { %v498_v61 = vpop.f32.mrb[0].mxu1 }
 0x24a   : > { %v515_v62 = vadd.f32 %v659_v60, %v498_v61  ;;  %v767_v63 = vpop.f32.mrb[1].mxu1 }
 0x24c   : > { %516 = vst [vmem:[%s306_s9] sm:$0xff] %v515_v62 }
 0x24d   : > { %1005 = shalt.err (!%p1002_p11)
}
 0x24e   : > { %s1006_s13 = scalar_lea.hbm %s1349_s14, 128  ;;  %s1010_s30 = scalar_lea.hbm %s1403_s5, 256 }
 0x24f   : > { %p1007_p0 = scmp.ne.s32.totalorder %s1349_s14, %s1006_s13  ;;  %p1011_p6 = scmp.lt.u32.totalorder %s1349_s14, %s1403_s5 }
 0x250   : > { %p1012_p7 = scmp.lt.u32.totalorder %s1010_s30, %s1006_s13  ;;  %p1014_p8 = scmp.lt.u32.totalorder %s1006_s13, %s1349_s14 }
 0x251   : > { %p1008_p4 = pnand %p1007_p0, %p1418_p12 }
 0x252   : > { %p1013_p2 = por %p1012_p7, %p1011_p6 }
 0x253   : > { %p1009_p13 = pneg %p1008_p4 }
 0x254   : > { %p1015_p1 = por %p1014_p8, %p1013_p2 }
 0x256   : > { %p1016_p10 = pnand %p1015_p1, %p1009_p13 }
 0x258   : > { %1019 = shalt.err (!%p1016_p10)
}
 0x259   : > { %826 = dma.vmem_to_hbm [thread:$0]  (%p1418_p12), %s1351_s11, 128, %s1349_s14, %s518_s10  }
 0x25a PF: > { %s543_s9 = sand.u32 1, %s1058_s18   ;;  %p1419_p3 = scmp.ne.s32.totalorder %s1411_s29, 0 }
 0x25b   : > { %p1420_p5 = scmp.ge.s32.totalorder %s1078_s23, 2  ;;  %s544_s15 = scalar_lea.sflag [#allocation5], %s543_s9 }
 0x25d   : > { %p840_p9 = pnand %p1420_p5, %p1419_p3 }
 0x25f   : > { %1053 = dma.done.wait (!%p840_p9), %s544_s15, 128  }
 0x260   : > { %1055 = vsyncadd (!%p840_p9), %s544_s15, 4294967168  ;;  %s22_s23 = sadd.s32 1, %s1078_s23   ;;  %s1421_s18 = smov %s1062_s19 }
 0x261   : > { %p19_p11 = scmp.ge.s32.totalorder %s22_s23, 4   ;;  %s1422_s19 = smov %s1066_s20 }
 0x262   : > { %s1423_s20 = smov %s1261_s6  ;;  %s1424_s21 = smov %s1074_s22 }
 0x263   : > { %s1425_s22 = smov %s1427_s12  ;;  %21 = sbr.rel (!%p19_p11) target bundleno = 7 (0x7), region = 106 }
 0x26a   :  { %549 = vsyncpa [#allocation4], 1 }
 0x26b   :  { %551 = vsyncpa [#allocation4 + $0x1], 1 }
 0x26c   :  { %552 = vsyncpa [#allocation7], 1 }
 0x26d   :  { %553 = vsyncpa [#allocation5], 1 }
 0x26e   :  { %555 = vsyncpa [#allocation5 + $0x1], 1 }

</bundles_post_ra>
